<compile_context>
chip_gen: v5e
topology: v5e:2x2
jax: 0.10.0
libtpu: 0.0.40
codegen_flags: <defaults>
</compile_context>

<pallas_src>
import jax
import jax.numpy as jnp
from jax.experimental import pallas as pl
from jax.experimental.pallas import tpu as pltpu

_MAX_LANE_WIDTH = 4096
_MIN_LANE_WIDTH = 128
_TARGET_BLOCK_BYTES = 4 * 1024 * 1024     # ~4 MiB per block, per buffer
_VMEM_LIMIT_BYTES = 32 * 1024 * 1024      # explicit: safe on v5e, default on v6e/v7x
_MIN_PALLAS_ELEMS = 1024                  # below this, plain jnp is cheaper


def _softplus_f32(x32):
    # stable softplus: log(1 + exp(x)) == max(x, 0) + log1p(exp(-|x|))
    return jnp.maximum(x32, 0.0) + jnp.log1p(jnp.exp(-jnp.abs(x32)))


def _mish_kernel(x_ref, o_ref):
    x32 = x_ref[...].astype(jnp.float32)
    o_ref[...] = (x32 * _softplus_f32(x32)).astype(o_ref.dtype)


def _mish_jnp(x):
    x32 = x.astype(jnp.float32)
    return (x32 * _softplus_f32(x32)).astype(x.dtype)


def _pick_lane_width(n: int):
    """Largest multiple of 128 (<= 4096) that divides n, else None."""
    for k in range(_MAX_LANE_WIDTH // _MIN_LANE_WIDTH, 0, -1):
        w = k * _MIN_LANE_WIDTH
        if n % w == 0:
            return w
    return None


def _mish_pallas_2d(x2d: jax.Array) -> jax.Array:
    rows, width = x2d.shape
    # Size blocks by bytes so bf16/int8 inputs get equally large DMAs.
    block_elems = max(8 * _MIN_LANE_WIDTH,
                      _TARGET_BLOCK_BYTES // x2d.dtype.itemsize)
    block_rows = max(8, (block_elems // width) // 8 * 8)   # multiple of 8
    if rows <= block_rows:
        block_rows = rows   # single block spanning the full row extent
    grid = (pl.cdiv(rows, block_rows),)   # last block masked if rows % block_rows

    return pl.pallas_call(
        _mish_kernel,
        out_shape=jax.ShapeDtypeStruct((rows, width), x2d.dtype),
        grid_spec=pltpu.PrefetchScalarGridSpec(
            num_scalar_prefetch=0,
            grid=grid,
            in_specs=[pl.BlockSpec((block_rows, width), lambda i: (i, 0))],
            out_specs=pl.BlockSpec((block_rows, width), lambda i: (i, 0)),
        ),
        compiler_params=pltpu.CompilerParams(
            dimension_semantics=("parallel",),
            vmem_limit_bytes=_VMEM_LIMIT_BYTES,
        ),
    )(x2d)


def mish(x: jax.Array) -> jax.Array:
    """Elementwise x * log(1 + exp(x)) via a Pallas TPU kernel. Any shape."""
    orig_shape = x.shape
    flat = x.reshape(-1)
    n = flat.shape[0]
    if n == 0:
        return x
    if n < _MIN_PALLAS_ELEMS:
        # Launch + single-grid-step overhead dominates: plain jnp.
        return _mish_jnp(flat).reshape(orig_shape)

    width = _pick_lane_width(n)
    if width is not None:
        out2d = _mish_pallas_2d(flat.reshape(n // width, width))
        return out2d.reshape(orig_shape)

    # Ragged: kernel over the largest 128-multiple prefix, tiny tail in jnp.
    width = _MIN_LANE_WIDTH
    n_main = (n // width) * width
    main = _mish_pallas_2d(flat[:n_main].reshape(n_main // width, width))
    tail = _mish_jnp(flat[n_main:])
    return jnp.concatenate([main.reshape(-1), tail]).reshape(orig_shape)


if __name__ == "__main__":
    key = jax.random.PRNGKey(0)

    # Main input: (N, *) — small NCHW-style tensor (2, 4, 16, 16).
    x = jax.random.normal(key, (2, 4, 16, 16), dtype=jnp.float32)
    out = jax.block_until_ready(mish(x))
    ref = x * jnp.log(1.0 + jnp.exp(x))
    assert out.shape == x.shape and out.dtype == x.dtype
    assert jnp.allclose(out, ref, atol=1e-5, rtol=1e-5)

    # Ragged size exercising the prefix-kernel + jnp-tail path.
    x2 = jax.random.normal(jax.random.PRNGKey(1), (3, 5, 700), dtype=jnp.float32)
    out2 = jax.block_until_ready(mish(x2))
    ref2 = x2 * jnp.log(1.0 + jnp.exp(x2))
    assert out2.shape == x2.shape
    assert jnp.allclose(out2, ref2, atol=1e-5, rtol=1e-5)

    # Tiny tensor exercising the small-size jnp fallback.
    x3 = jax.random.normal(jax.random.PRNGKey(2), (3, 5, 7), dtype=jnp.float32)
    out3 = jax.block_until_ready(mish(x3))
    ref3 = x3 * jnp.log(1.0 + jnp.exp(x3))
    assert jnp.allclose(out3, ref3, atol=1e-5, rtol=1e-5)

    print("KERNEL_OK")
</pallas_src>

<mosaic_0001>
module attributes {stable_mosaic.version = 11 : i64} {
  func.func @_mish_kernel(%arg0: i32, %arg1: memref<1x2048xf32, #tpu.memory_space<vmem>>, %arg2: memref<1x2048xf32, #tpu.memory_space<vmem>>) attributes {dimension_semantics = [#tpu.dimension_semantics<parallel>], iteration_bounds = array<i64: 1>, scalar_prefetch = 0 : i64, scratch_operands = 0 : i64, tpu.core_type = #tpu.core_type<tc>, window_params = [{transform_indices = @transform_0, window_bounds = array<i64: 1, 2048>}, {transform_indices = @transform_1, window_bounds = array<i64: 1, 2048>}]} {
    %c0 = arith.constant 0 : index
    %c0_0 = arith.constant 0 : index
    %0 = vector.load %arg1[%c0, %c0_0] : memref<1x2048xf32, #tpu.memory_space<vmem>>, vector<1x2048xf32>
    %cst = arith.constant 0.000000e+00 : f32
    %1 = vector.broadcast %cst : f32 to vector<1x2048xf32>
    %2 = arith.maximumf %0, %1 : vector<1x2048xf32>
    %3 = math.absf %0 : vector<1x2048xf32>
    %cst_1 = arith.constant 0.000000e+00 : f32
    %4 = vector.broadcast %cst_1 : f32 to vector<1x2048xf32>
    %5 = arith.subf %4, %3 : vector<1x2048xf32>
    %6 = math.exp %5 : vector<1x2048xf32>
    %7 = math.log1p %6 : vector<1x2048xf32>
    %8 = arith.addf %2, %7 : vector<1x2048xf32>
    %9 = arith.mulf %0, %8 : vector<1x2048xf32>
    %c0_2 = arith.constant 0 : index
    %c0_3 = arith.constant 0 : index
    %10 = vector.load %arg2[%c0_2, %c0_3] : memref<1x2048xf32, #tpu.memory_space<vmem>>, vector<1x2048xf32>
    tpu.vector_store %arg2[%c0_2, %c0_3], %9 {strides = array<i32>} : memref<1x2048xf32, #tpu.memory_space<vmem>>, vector<1x2048xf32>,
    return
  }
  func.func @transform_0(%arg0: i32) -> (i32, i32) {
    %c0_i32 = arith.constant 0 : i32
    %c0_i32_0 = arith.constant 0 : i32
    return %arg0, %c0_i32 : i32, i32
  }
  func.func @transform_1(%arg0: i32) -> (i32, i32) {
    %c0_i32 = arith.constant 0 : i32
    %c0_i32_0 = arith.constant 0 : i32
    return %arg0, %c0_i32 : i32, i32
  }
}

</mosaic_0001>

<bundles_post_ra>
// kernel: tpu_custom_call.1
= control target key start
LH: loop header
LB: loop body
LE: loop exit
PB: predicated region body
PF: predicated region fallthrough
CT: control target
= control target key end

     0   :  { %6 = vsyncpa [#allocation3], 0  ;;  %s156_s0 = inlined_call_operand.hbm [shape: f32[1,2048], index: 0, kind: input, shape index: {}]   ;;  %s157_s1 = inlined_call_operand.hbm [shape: f32[1,2048], index: 1, kind: output, shape index: {}]  }
   0x1   :  { %7 = vsyncpa [#allocation4], 0  ;;  %s13_s8 = sshll.u32 %s156_s0, 4  ;;  %s138_s9 = smov [#allocation2]   ;;  %s14_s8 = int_to_ptr.hbm [resolvable:$true] %s13_s8 }
   0x2   :  { %s15_s10 = sshll.u32 %s138_s9, 4  ;;  %s16_s10 = int_to_ptr.vmem [resolvable:$true] %s15_s10 }
   0x3   :  { %18 = dma.hbm_to_vmem [thread:$0]  %s14_s8, 256, %s16_s10, [#allocation3]  }
   0x4   :  { %134 = dma.done.wait [#allocation3], 256  }
   0x5   :  { %135 = vsyncadd [#allocation3], 4294967040  ;;  %v23_v0 = vld [vmem:[#allocation2] sm:$0xff]  ;;  %v24_v1 = vld [vmem:[#allocation2 + $0x8] sm:$0xff]  ;;  %s139_s0 = smov [#allocation5]   ;;  %s66_s14 = sshll.u32 %s157_s1, 4  ;;  %s67_s14 = int_to_ptr.hbm [resolvable:$true] %s66_s14 }
   0x6   :  { %v27_v2 = vand.u32 2147483647, %v23_v0  ;;  %v28_v3 = vand.u32 2147483647, %v24_v1  ;;  %v25_v20 = vmax.f32 %v23_v0, 0.0  ;;  %v26_v24 = vmax.f32 %v24_v1, 0.0 }
   0x7   :  { %s64_s11 = sshll.u32 %s139_s0, 4  ;;  %s65_s11 = int_to_ptr.vmem [resolvable:$true] %s64_s11 }
   0x8   :  { %v29_v4 = vsub.f32 0.0, %v27_v2  ;;  %v30_v5 = vsub.f32 0.0, %v28_v3 }
   0xa   :  { %v31_v6 = vmul.f32 1.442695, %v29_v4  ;;  %v33_v7 = vmul.f32 1.442695, %v30_v5 }
   0xc   :  { %78 = vpow2.f32 %v31_v6 }
   0xd   :  { %80 = vpow2.f32 %v33_v7 }
  0x12   :  { %v79_v8 = vpop.eup %78 }
  0x13   :  { %v81_v9 = vpop.eup %80  ;;  %v35_v10 = vadd.f32 1.0, %v79_v8  ;;  %v38_v11 = vmul.f32 -0.5, %v79_v8  ;;  %v41_v15 = vand.u32 2147483647, %v79_v8 }
  0x14   :  { %v44_v12 = vadd.f32 1.0, %v81_v9  ;;  %v47_v13 = vmul.f32 -0.5, %v81_v9  ;;  %v50_v17 = vand.u32 2147483647, %v81_v9 }
  0x15   :  { %82 = vlog2.f32 %v35_v10  ;;  %v39_v14 = vadd.f32 1.0, %v38_v11  ;;  %vm42_vm0 = vcmp.lt.f32.partialorder %v41_v15, 0.0004427343 }
  0x16   :  { %84 = vlog2.f32 %v44_v12  ;;  %v48_v16 = vadd.f32 1.0, %v47_v13  ;;  %vm51_vm1 = vcmp.lt.f32.partialorder %v50_v17, 0.0004427343 }
  0x17   :  { %v40_v18 = vmul.f32 %v79_v8, %v39_v14 }
  0x18   :  { %v49_v21 = vmul.f32 %v81_v9, %v48_v16 }
  0x1b   :  { %v83_v19 = vpop.eup %82 }
  0x1c   :  { %v85_v22 = vpop.eup %84  ;;  %v37_v23 = vmul.f32 0.6931472, %v83_v19 }
  0x1d   :  { %v46_v25 = vmul.f32 0.6931472, %v85_v22 }
  0x1e   :  { %v43_v26 = vsel %vm42_vm0, %v40_v18, %v37_v23 }
  0x1f   :  { %v53_v27 = vadd.f32 %v43_v26, %v25_v20  ;;  %v52_v28 = vsel %vm51_vm1, %v49_v21, %v46_v25 }
  0x20   :  { %v54_v29 = vadd.f32 %v52_v28, %v26_v24 }
  0x21   :  { %v55_v30 = vmul.f32 %v53_v27, %v23_v0 }
  0x22   :  { %v56_v31 = vmul.f32 %v54_v29, %v24_v1 }
  0x23   :  { %57 = vst [vmem:[#allocation5] sm:$0xff] %v55_v30 }
  0x24   :  { %58 = vst [vmem:[#allocation5 + $0x8] sm:$0xff] %v56_v31 }
  0x25   :  { %69 = dma.vmem_to_hbm [thread:$0]  %s65_s11, 256, %s67_s14, [#allocation4]  }
  0x26   :  { %136 = dma.done.wait [#allocation4], 256  }
  0x27   :  { %137 = vsyncadd [#allocation4], 4294967040 }
  0x28   :  { %74 = vsyncpa [#allocation3], 1 }
  0x29   :  { %75 = vsyncpa [#allocation4], 1 }

</bundles_post_ra>
